<compile_context>
chip_gen: v7x
topology: tpu7x:2x2x1
jax: 0.10.0
libtpu: 0.0.40
codegen_flags: <defaults>
</compile_context>

<pallas_src>
import jax
import jax.numpy as jnp
from jax import lax
from jax.experimental import pallas as pl
from jax.experimental.pallas import tpu as pltpu

_LANE = 128
_SUBLANE = 8


def _outconv_kernel(x_ref, w_ref, b_ref, o_ref):
    # x_ref: (nb, C_in, t)   -- nb batch elements, t pixels on the lane axis
    # w_ref: (C_out, C_in)   -- resident weight block (loaded once)
    # b_ref: (C_out, 1)
    # o_ref: (nb, C_out, t)
    w = w_ref[...]
    bias = b_ref[...]
    nb = x_ref.shape[0]

    def compute(i):
        acc = jnp.dot(w, x_ref[i], preferred_element_type=jnp.float32) + bias
        o_ref[i] = acc.astype(o_ref.dtype)

    if nb <= 8:
        # Tiny static trip count: unroll in Python (LLO sees straight-line code).
        for i in range(nb):
            compute(i)
    else:
        def body(i, carry):
            compute(i)
            return carry
        lax.fori_loop(0, nb, body, 0)


def out_conv(x_nchw, weight, bias, *, pixel_budget=131072):
    """1x1 conv (NCHW in, NCHW out).

    x_nchw : (N, C_in, H, W)
    weight : (C_out, C_in, 1, 1)   -- PyTorch Conv2d weight layout
    bias   : (C_out,)
    pixel_budget : target number of pixels moved per grid step (lane aligned).
    returns (N, C_out, H, W)
    """
    N, C_in, H, W = x_nchw.shape
    C_out = weight.shape[0]
    P = H * W

    # Free reshapes (no HBM data movement).
    x_r = x_nchw.reshape(N, C_in, P)
    w_mat = weight.reshape(C_out, C_in)
    b_mat = bias.reshape(C_out, 1)

    # ---- tile selection: size per-step payload for the HBM roofline ----
    budget = max(_LANE, (pixel_budget // _LANE) * _LANE)   # lane aligned
    p_lane = pl.cdiv(P, _LANE) * _LANE                     # lane-padded footprint
    if p_lane > budget:
        # Large image: one batch element per step, big lane-aligned pixel tile.
        nb = 1
        t = budget                       # multiple of 128 and <= P (guaranteed)
    else:
        # Small image: take the full pixel extent and block batch elements so
        # nb * p_lane ~= budget.  t == full dim, so no (8,128) constraint.
        t = P
        nb = max(1, min(N, budget // p_lane))

    grid = (pl.cdiv(N, nb), pl.cdiv(P, t))   # ragged tails -> partial blocks

    # ---- VMEM budget (sublane + lane padded, double buffered) ----
    sub_in = pl.cdiv(C_in, _SUBLANE) * _SUBLANE
    sub_out = pl.cdiv(C_out, _SUBLANE) * _SUBLANE
    t_pad = pl.cdiv(t, _LANE) * _LANE
    working = 2 * 4 * nb * t_pad * (sub_in + sub_out)      # bytes, 2x buffered
    vmem_limit = int(min(64 * 1024 * 1024,
                         max(32 * 1024 * 1024, 1.5 * working + (2 << 20))))

    itemsize = jnp.dtype(x_nchw.dtype).itemsize
    cost = pl.CostEstimate(
        flops=2 * N * P * C_in * C_out,
        transcendentals=0,
        bytes_accessed=itemsize * N * P * (C_in + C_out)
        + w_mat.dtype.itemsize * C_out * (C_in + 1),
    )

    out_r = pl.pallas_call(
        _outconv_kernel,
        out_shape=jax.ShapeDtypeStruct((N, C_out, P), x_nchw.dtype),
        grid_spec=pltpu.PrefetchScalarGridSpec(
            num_scalar_prefetch=0,
            grid=grid,
            in_specs=[
                pl.BlockSpec((nb, C_in, t), lambda n, p: (n, 0, p)),
                pl.BlockSpec((C_out, C_in), lambda n, p: (0, 0)),
                pl.BlockSpec((C_out, 1), lambda n, p: (0, 0)),
            ],
            out_specs=pl.BlockSpec((nb, C_out, t), lambda n, p: (n, 0, p)),
        ),
        compiler_params=pltpu.CompilerParams(
            dimension_semantics=("parallel", "parallel"),
            vmem_limit_bytes=vmem_limit,
        ),
        cost_estimate=cost,
    )(x_r, w_mat, b_mat)

    # Free reshape back to NCHW.
    return out_r.reshape(N, C_out, H, W)


def _ref_conv1x1(x, weight, bias):
    C_out, C_in = weight.shape[0], weight.shape[1]
    return (
        jnp.einsum("nchw,oc->nohw", x, weight.reshape(C_out, C_in))
        + bias[None, :, None, None]
    )


if __name__ == "__main__":
    key = jax.random.PRNGKey(0)
    k_x, k_w, k_b, k_x2, k_x3 = jax.random.split(key, 5)

    N, C_in, C_out, Hs, Ws = 2, 4, 3, 16, 16

    x = jax.random.normal(k_x, (N, C_in, Hs, Ws), dtype=jnp.float32)
    # Deterministic synthetic parameters (Conv2d(in_ch, out_ch, 1) shapes).
    weight = jax.random.normal(k_w, (C_out, C_in, 1, 1), dtype=jnp.float32) * 0.1
    bias = jax.random.normal(k_b, (C_out,), dtype=jnp.float32) * 0.1

    # Default path: small image -> batch-blocked, full pixel extent per step.
    out = jax.block_until_ready(out_conv(x, weight, bias))
    ref = _ref_conv1x1(x, weight, bias)
    assert out.shape == (N, C_out, Hs, Ws)
    assert jnp.allclose(out, ref, atol=1e-5, rtol=1e-5)

    # Ragged pixel count (H*W not a multiple of 128), t == full extent path.
    x2 = jax.random.normal(k_x2, (N, C_in, 10, 10), dtype=jnp.float32)
    out2 = jax.block_until_ready(out_conv(x2, weight, bias))
    ref2 = _ref_conv1x1(x2, weight, bias)
    assert out2.shape == (N, C_out, 10, 10)
    assert jnp.allclose(out2, ref2, atol=1e-5, rtol=1e-5)

    # Force the large-image path (nb=1, lane-aligned t, partial final pixel
    # block handled by Pallas masking) with a tiny pixel budget.
    x3 = jax.random.normal(k_x3, (3, C_in, 15, 20), dtype=jnp.float32)
    ref3 = _ref_conv1x1(x3, weight, bias)
    out3 = jax.block_until_ready(out_conv(x3, weight, bias, pixel_budget=128))
    assert jnp.allclose(out3, ref3, atol=1e-5, rtol=1e-5)

    # Force batch blocking with a ragged batch tail (N=3, nb=2 -> partial block).
    out4 = jax.block_until_ready(out_conv(x3, weight, bias, pixel_budget=1024))
    assert jnp.allclose(out4, ref3, atol=1e-5, rtol=1e-5)

    print("KERNEL_OK")
</pallas_src>

<mosaic_0001>
module attributes {stable_mosaic.version = 11 : i64} {
  func.func @_outconv_kernel(%arg0: i32, %arg1: i32, %arg2: memref<2x4x256xf32, #tpu.memory_space<vmem>>, %arg3: memref<3x4xf32, #tpu.memory_space<vmem>>, %arg4: memref<3x1xf32, #tpu.memory_space<vmem>>, %arg5: memref<2x3x256xf32, #tpu.memory_space<vmem>>) attributes {dimension_semantics = [#tpu.dimension_semantics<parallel>, #tpu.dimension_semantics<parallel>], iteration_bounds = array<i64: 1, 1>, scalar_prefetch = 0 : i64, scratch_operands = 0 : i64, tpu.core_type = #tpu.core_type<tc>, window_params = [{transform_indices = @transform_0, window_bounds = array<i64: 2, 4, 256>}, {pipeline_mode = #tpu.pipeline_mode<synchronous>, transform_indices = @transform_1, window_bounds = array<i64: 3, 4>}, {pipeline_mode = #tpu.pipeline_mode<synchronous>, transform_indices = @transform_2, window_bounds = array<i64: 3, 1>}, {transform_indices = @transform_3, window_bounds = array<i64: 2, 3, 256>}]} {
    %c0 = arith.constant 0 : index
    %c0_0 = arith.constant 0 : index
    %0 = vector.load %arg3[%c0, %c0_0] : memref<3x4xf32, #tpu.memory_space<vmem>>, vector<3x4xf32>
    %c0_1 = arith.constant 0 : index
    %c0_2 = arith.constant 0 : index
    %1 = vector.load %arg4[%c0_1, %c0_2] : memref<3x1xf32, #tpu.memory_space<vmem>>, vector<3x1xf32>
    %c0_3 = arith.constant 0 : index
    %c0_4 = arith.constant 0 : index
    %c0_5 = arith.constant 0 : index
    %2 = vector.load %arg2[%c0_3, %c0_4, %c0_5] : memref<2x4x256xf32, #tpu.memory_space<vmem>>, vector<1x4x256xf32>
    %3 = vector.shape_cast %2 : vector<1x4x256xf32> to vector<4x256xf32>
    %cst = arith.constant dense<0.000000e+00> : vector<3x256xf32>
    %4 = tpu.matmul %0, %3, %cst {dimension_numbers = #tpu.dot_dimension_numbers<[1], [0], [0], [1], [0, 0, 1, 1], [], []>} : vector<3x4xf32>, vector<4x256xf32>, vector<3x256xf32> -> vector<3x256xf32>
    %5 = vector.broadcast %1 : vector<3x1xf32> to vector<3x256xf32>
    %6 = arith.addf %4, %5 : vector<3x256xf32>
    %c0_6 = arith.constant 0 : index
    %c0_7 = arith.constant 0 : index
    %c0_8 = arith.constant 0 : index
    %7 = vector.load %arg5[%c0_6, %c0_7, %c0_8] : memref<2x3x256xf32, #tpu.memory_space<vmem>>, vector<1x3x256xf32>
    %8 = vector.shape_cast %7 : vector<1x3x256xf32> to vector<3x256xf32>
    %9 = vector.shape_cast %6 : vector<3x256xf32> to vector<1x3x256xf32>
    tpu.vector_store %arg5[%c0_6, %c0_7, %c0_8], %9 {strides = array<i32>} : memref<2x3x256xf32, #tpu.memory_space<vmem>>, vector<1x3x256xf32>,
    %c1 = arith.constant 1 : index
    %c0_9 = arith.constant 0 : index
    %c0_10 = arith.constant 0 : index
    %10 = vector.load %arg2[%c1, %c0_9, %c0_10] : memref<2x4x256xf32, #tpu.memory_space<vmem>>, vector<1x4x256xf32>
    %11 = vector.shape_cast %10 : vector<1x4x256xf32> to vector<4x256xf32>
    %cst_11 = arith.constant dense<0.000000e+00> : vector<3x256xf32>
    %12 = tpu.matmul %0, %11, %cst_11 {dimension_numbers = #tpu.dot_dimension_numbers<[1], [0], [0], [1], [0, 0, 1, 1], [], []>} : vector<3x4xf32>, vector<4x256xf32>, vector<3x256xf32> -> vector<3x256xf32>
    %13 = vector.broadcast %1 : vector<3x1xf32> to vector<3x256xf32>
    %14 = arith.addf %12, %13 : vector<3x256xf32>
    %c1_12 = arith.constant 1 : index
    %c0_13 = arith.constant 0 : index
    %c0_14 = arith.constant 0 : index
    %15 = vector.load %arg5[%c1_12, %c0_13, %c0_14] : memref<2x3x256xf32, #tpu.memory_space<vmem>>, vector<1x3x256xf32>
    %16 = vector.shape_cast %15 : vector<1x3x256xf32> to vector<3x256xf32>
    %17 = vector.shape_cast %14 : vector<3x256xf32> to vector<1x3x256xf32>
    tpu.vector_store %arg5[%c1_12, %c0_13, %c0_14], %17 {strides = array<i32>} : memref<2x3x256xf32, #tpu.memory_space<vmem>>, vector<1x3x256xf32>,
    return
  }
  func.func @transform_0(%arg0: i32, %arg1: i32) -> (i32, i32, i32) {
    %c0_i32 = arith.constant 0 : i32
    %c0_i32_0 = arith.constant 0 : i32
    return %arg0, %c0_i32, %arg1 : i32, i32, i32
  }
  func.func @transform_1(%arg0: i32, %arg1: i32) -> (i32, i32) {
    %c0_i32 = arith.constant 0 : i32
    %c0_i32_0 = arith.constant 0 : i32
    %c0_i32_1 = arith.constant 0 : i32
    return %c0_i32, %c0_i32_0 : i32, i32
  }
  func.func @transform_2(%arg0: i32, %arg1: i32) -> (i32, i32) {
    %c0_i32 = arith.constant 0 : i32
    %c0_i32_0 = arith.constant 0 : i32
    %c0_i32_1 = arith.constant 0 : i32
    return %c0_i32, %c0_i32_0 : i32, i32
  }
  func.func @transform_3(%arg0: i32, %arg1: i32) -> (i32, i32, i32) {
    %c0_i32 = arith.constant 0 : i32
    %c0_i32_0 = arith.constant 0 : i32
    return %arg0, %c0_i32, %arg1 : i32, i32, i32
  }
}

</mosaic_0001>

<bundles_post_ra>
// kernel: tpu_custom_call.1
= control target key start
LH: loop header
LB: loop body
LE: loop exit
PB: predicated region body
PF: predicated region fallthrough
CT: control target
= control target key end

     0   :  { %8 = vsyncpa [#allocation3], 0  ;;  %s252_s12 = smov [#allocation2]   ;;  %s301_s0 = inlined_call_operand.hbm [shape: f32[2,4,256], index: 0, kind: input, shape index: {}]   ;;  %s302_s1 = inlined_call_operand.vmem [shape: f32[3,4], index: 1, kind: input, shape index: {}]   ;;  %s303_s2 = inlined_call_operand.vmem [shape: f32[3,1], index: 2, kind: input, shape index: {}]   ;;  %s304_s3 = inlined_call_operand.vmem [shape: f32[2,3,256], index: 3, kind: output, shape index: {}]  }
   0x1   :  { %s14_s13 = sshll.u32 %s252_s12, 4  ;;  %s228_s16 = scalar_lea.hbm %s301_s0, 256  ;;  %s15_s13 = int_to_ptr.vmem [resolvable:$true] %s14_s13 }
   0x2   :  { %p229_p0 = scmp.ne.s32.totalorder %s301_s0, %s228_s16  ;;  %p232_p1 = scmp.lt.u32.totalorder %s228_s16, %s301_s0 }
   0x4   :  { %p234_p2 = pnand %p232_p1, %p229_p0 }
   0x6   :  { %237 = shalt.err (!%p234_p2)
}
   0x7   :  { %s238_s21 = scalar_lea.vmem %s15_s13, 256  ;;  %p243_p4 = scmp.lt.s32.totalorder %s15_s13, %s15_s13 }
   0x8   :  { %p239_p3 = scmp.ne.s32.totalorder %s15_s13, %s238_s21  ;;  %p244_p5 = scmp.lt.s32.totalorder %s238_s21, %s238_s21 }
   0xa   :  { %p245_p6 = por %p244_p5, %p243_p4 }
   0xc   :  { %p246_p7 = pnand %p245_p6, %p239_p3 }
   0xe   :  { %249 = shalt.err (!%p246_p7)
}
   0xf   :  { %s253_s22 = smov 128   ;;  %s254_s23 = smov 8  }
  0x10   :  { %20 = dma.hbm_to_vmem [thread:$0]  %s301_s0, 256, %s15_s13, [#allocation3], %s253_s22, %s253_s22, %s254_s23  }
  0x11   :  { %250 = dma.done.wait [#allocation3], 256  }
  0x12   :  { %251 = vsyncadd [#allocation3], 4294967040  ;;  %v255_v0 = vmov 0.0   ;;  %v256_v1 = vmov 0   ;;  %v30_v2 = vld [vmem:[#allocation2] sm:$0xff]  ;;  %vm42_vm0 = vcmask 1043456  }
  0x13   :  { %111 = vmatprep.mubr.f32.mxu0 %v255_v0  ;;  %195 = vmatprep.mubr.f32.mxu1 %v255_v0  ;;  %v124_v3 = vld [vmem:[#allocation2 + $0x8] sm:$0xff]  ;;  %v37_v4 = vcombine.high %v30_v2, %v30_v2  ;;  %v29_v6 = vld [vmem:[%s303_s2] sm:$0x7]  ;;  %vm38_vm1 = vcmask 31744  }
  0x14   :  { %225 = vset.pattern.permute.xlu0 %v256_v1  ;;  %v126_v5 = vcombine.high %v124_v3, %v124_v3  ;;  %v28_v7 = vld [vmem:[%s302_s1] sm:$0x7] }
  0x15   :  { %33 = vperm.xlu0 %225, %v29_v6   ;;  %213 = vmatprep.subr.msk.mxu0 %vm42_vm0, %v37_v4 }
  0x16   :  { %216 = vmatprep.subr.msk.mxu1 %vm42_vm0, %v126_v5  ;;  %214 = vmatpush1.msk.msra.mxu0 %vm42_vm0, %v30_v2 }
  0x17   :  { %217 = vmatpush1.msk.msra.mxu1 %vm42_vm0, %v124_v3  ;;  %215 = vmatmul.mubr.msk.f32.vlgmr.msra.gmra.mrb[0].mxu0 %vm38_vm1, %v28_v7 }
  0x18   :  { %218 = vmatmul.mubr.msk.f32.vlgmr.msra.gmra.mrb[0].mxu1 %vm38_vm1, %v28_v7 }
  0x94   :  { %v34_v8 = vpop.permute.xlu0 %33 }
  0xea   :  { %v113_v9 = vpop.f32.mrb[0].mxu0 }
  0xeb   :  { %v197_v10 = vpop.f32.mrb[0].mxu1  ;;  %v114_v11 = vadd.f32 %v113_v9, %v34_v8  ;;  %v115_v13 = vpop.f32.mrb[1].mxu0 }
  0xec   :  { %v198_v12 = vadd.f32 %v197_v10, %v34_v8  ;;  %v199_v14 = vpop.f32.mrb[1].mxu1  ;;  %v116_v15 = vadd.f32 %v115_v13, %v34_v8 }
  0xed   :  { %v200_v16 = vadd.f32 %v199_v14, %v34_v8 }
  0xee   :  { %v120_v17 = vcombine.low %v114_v11, %v116_v15 }
  0xef   :  { %v204_v18 = vcombine.low %v198_v12, %v200_v16 }
  0xf0   :  { %122 = vst [vmem:[%s304_s3] sm:$0x77] %v120_v17 }
  0xf1   :  { %219 = vst [vmem:[%s304_s3 + $0x8] sm:$0x77] %v204_v18 }
  0xf2   :  { %212 = vsyncpa [#allocation3], 1 }

</bundles_post_ra>
